<compile_context>
chip_gen: v7x
topology: tpu7x:2x2x1
jax: 0.10.0
libtpu: 0.0.40
codegen_flags: <defaults>
</compile_context>

<pallas_src>
import functools
import math

import jax
import jax.numpy as jnp
from jax.experimental import pallas as pl
from jax.experimental.pallas import tpu as pltpu


_NEG_BIG = -1e30  # finite "minus infinity" for masking (avoids inf-inf NaNs)


# --------------------------------------------------------------------------
# helpers
# --------------------------------------------------------------------------
def _fit_tile(dim, target, align):
    """Largest multiple of `align` dividing `dim` that is <= target.

    Falls back to the full dimension (always a legal Mosaic block shape) when
    no aligned divisor exists, so blocks are always (8,128)-aligned or span
    the whole axis.
    """
    if dim <= target:
        return dim
    t = (target // align) * align
    while t >= align:
        if dim % t == 0:
            return t
        t -= align
    return dim


# --------------------------------------------------------------------------
# Tiled projection matmul kernel (QKV projection and output projection)
# bf16 MXU operands, f32 VMEM accumulator.
# --------------------------------------------------------------------------
def _matmul_kernel(x_ref, w_ref, o_ref, acc_ref):
    @pl.when(pl.program_id(2) == 0)
    def _init():
        acc_ref[...] = jnp.zeros_like(acc_ref)

    acc_ref[...] += jnp.dot(
        x_ref[...], w_ref[...], preferred_element_type=jnp.float32
    )

    @pl.when(pl.program_id(2) == pl.num_programs(2) - 1)
    def _store():
        o_ref[...] = acc_ref[...].astype(o_ref.dtype)


def pallas_matmul(x, w, *, out_dtype=None, tm=256, tn=512, tk=1024):
    """y = x @ w with bf16 MXU operands and an f32 accumulator."""
    M, K = x.shape
    K2, N = w.shape
    assert K == K2
    out_dtype = out_dtype or x.dtype
    x = x.astype(jnp.bfloat16)
    w = w.astype(jnp.bfloat16)

    tm = _fit_tile(M, tm, 8)      # sublane dim of x/out blocks
    tn = _fit_tile(N, tn, 128)    # lane dim of w/out blocks (lane-dense stores)
    tk = _fit_tile(K, tk, 128)    # lane dim of x block / sublane dim of w block
    grid = (M // tm, N // tn, K // tk)

    cost = pl.CostEstimate(
        flops=2 * M * N * K,
        transcendentals=0,
        bytes_accessed=int((M * K + K * N) * 2
                           + M * N * jnp.dtype(out_dtype).itemsize),
    )
    return pl.pallas_call(
        _matmul_kernel,
        out_shape=jax.ShapeDtypeStruct((M, N), out_dtype),
        grid=grid,
        in_specs=[
            pl.BlockSpec((tm, tk), lambda i, j, k: (i, k)),
            pl.BlockSpec((tk, tn), lambda i, j, k: (k, j)),
        ],
        out_specs=pl.BlockSpec((tm, tn), lambda i, j, k: (i, j)),
        scratch_shapes=[pltpu.VMEM((tm, tn), jnp.float32)],
        compiler_params=pltpu.CompilerParams(
            dimension_semantics=("parallel", "parallel", "arbitrary")),
        cost_estimate=cost,
    )(x, w)


# --------------------------------------------------------------------------
# Flash-style attention kernel: per-head RMSNorm + RoPE + causal online
# softmax.  Grid = (B*H, num_kv_blocks); each program owns one (batch, head)
# pair, streams KV blocks, and writes one lane-dense (T, D) output block.
# --------------------------------------------------------------------------
def _attn_kernel(qw_ref, kw_ref, vw_ref, q_ref, k_ref, v_ref,
                 cos_ref, sin_ref, o_ref,
                 qn_sc, m_sc, l_sc, acc_sc, *, scale, eps):
    kv = pl.program_id(1)
    T, D = q_ref.shape[1], q_ref.shape[2]
    bkv = k_ref.shape[1]
    half = D // 2

    # RMSNorm over head_dim: x * rsqrt(mean(x^2) + eps) * w
    def rms(x, w):
        var = jnp.mean(x * x, axis=-1, keepdims=True)
        return x * jax.lax.rsqrt(var + eps) * w

    # RoPE, rotate-half convention (matches ai_edge_torch apply_rope).
    def rope(x, cos, sin):
        x1 = x[:, :half]
        x2 = x[:, half:]
        rot = jnp.concatenate([-x2, x1], axis=-1)
        return x * cos + rot * sin

    # ---- once per (batch, head): norm+rope q, reset online-softmax state ----
    @pl.when(kv == 0)
    def _init():
        qw = qw_ref[...].astype(jnp.float32) * scale   # fold 1/sqrt(D) into q norm
        q = q_ref[0].astype(jnp.float32)
        qn = rope(rms(q, qw),
                  cos_ref[...].astype(jnp.float32),
                  sin_ref[...].astype(jnp.float32))
        qn_sc[...] = qn.astype(jnp.bfloat16)
        m_sc[...] = jnp.full_like(m_sc, _NEG_BIG)
        l_sc[...] = jnp.zeros_like(l_sc)
        acc_sc[...] = jnp.zeros_like(acc_sc)

    # ---- per KV block: norm+rope k, norm v, online softmax update ----
    off = pl.multiple_of(kv * bkv, bkv)
    cos_k = cos_ref[pl.ds(off, bkv), :].astype(jnp.float32)
    sin_k = sin_ref[pl.ds(off, bkv), :].astype(jnp.float32)
    kw = kw_ref[...].astype(jnp.float32)
    vw = vw_ref[...].astype(jnp.float32)

    kb = rope(rms(k_ref[0].astype(jnp.float32), kw), cos_k, sin_k)
    vb = rms(v_ref[0].astype(jnp.float32), vw)

    # s = q @ k^T  (bf16 MXU operands, f32 accumulation), shape (T, bkv)
    s = jax.lax.dot_general(
        qn_sc[...], kb.astype(jnp.bfloat16),
        (((1,), (1,)), ((), ())),
        preferred_element_type=jnp.float32)

    row = jax.lax.broadcasted_iota(jnp.int32, (T, bkv), 0)
    col = jax.lax.broadcasted_iota(jnp.int32, (T, bkv), 1) + kv * bkv
    s = jnp.where(col <= row, s, _NEG_BIG)               # finite causal mask

    m_new = jnp.maximum(m_sc[...], jnp.max(s, axis=-1, keepdims=True))
    a = jnp.exp(m_sc[...] - m_new)
    p = jnp.exp(s - m_new)
    l_sc[...] = a * l_sc[...] + jnp.sum(p, axis=-1, keepdims=True)
    acc_sc[...] = a * acc_sc[...] + jnp.dot(
        p.astype(jnp.bfloat16), vb.astype(jnp.bfloat16),
        preferred_element_type=jnp.float32)
    m_sc[...] = m_new

    @pl.when(kv == pl.num_programs(1) - 1)
    def _finalize():
        o_ref[0] = (acc_sc[...] * pl.reciprocal(l_sc[...], approx=True)
                    ).astype(o_ref.dtype)


def pallas_attention(q, k, v, qw, kw, vw, cos, sin, *, scale, eps=1e-6,
                     block_kv=512):
    """q, k, v: (B*H, T, D) head-contiguous blocks.  Returns (B*H, T, D) bf16."""
    BH, T, D = q.shape
    bkv = _fit_tile(T, block_kv, 8)
    nkv = T // bkv

    kernel = functools.partial(_attn_kernel, scale=scale, eps=eps)
    cost = pl.CostEstimate(
        flops=4 * BH * T * T * D,
        transcendentals=BH * T * T,
        bytes_accessed=int(3 * BH * T * D * 2 + BH * T * D * 2),
    )
    return pl.pallas_call(
        kernel,
        out_shape=jax.ShapeDtypeStruct((BH, T, D), jnp.bfloat16),
        grid=(BH, nkv),
        in_specs=[
            pl.BlockSpec((1, D), lambda bh, kv: (0, 0)),            # q norm w
            pl.BlockSpec((1, D), lambda bh, kv: (0, 0)),            # k norm w
            pl.BlockSpec((1, D), lambda bh, kv: (0, 0)),            # v norm w
            pl.BlockSpec((1, T, D), lambda bh, kv: (bh, 0, 0)),     # q (resident)
            pl.BlockSpec((1, bkv, D), lambda bh, kv: (bh, kv, 0)),  # k block
            pl.BlockSpec((1, bkv, D), lambda bh, kv: (bh, kv, 0)),  # v block
            pl.BlockSpec((T, D), lambda bh, kv: (0, 0)),            # cos table
            pl.BlockSpec((T, D), lambda bh, kv: (0, 0)),            # sin table
        ],
        out_specs=pl.BlockSpec((1, T, D), lambda bh, kv: (bh, 0, 0)),
        scratch_shapes=[
            pltpu.VMEM((T, D), jnp.bfloat16),   # normalized + roped q
            pltpu.VMEM((T, 1), jnp.float32),    # running max
            pltpu.VMEM((T, 1), jnp.float32),    # running sum
            pltpu.VMEM((T, D), jnp.float32),    # output accumulator
        ],
        compiler_params=pltpu.CompilerParams(
            dimension_semantics=("parallel", "arbitrary")),
        cost_estimate=cost,
    )(qw, kw, vw, q, k, v, cos, sin)


# --------------------------------------------------------------------------
# Full forward: QKV projection -> per-head attention -> output projection.
# Intermediates live in bf16; relayouts are one XLA transpose each way.
# --------------------------------------------------------------------------
def causal_self_attention(x, params, cos, sin):
    B, T, C = x.shape
    H = params["num_heads"]
    D = C // H

    # QKV projection (bf16 MXU operands, bf16 HBM intermediate).
    qkv = pallas_matmul(x.reshape(B * T, C), params["w_qkv"],
                        out_dtype=jnp.bfloat16)                    # (B*T, 3C)

    # Head-contiguous relayout so the attention kernel gets full-dim (T, D)
    # blocks per (batch, head) program (layout plumbing, done once by XLA).
    qkv = qkv.reshape(B, T, 3, H, D).transpose(2, 0, 3, 1, 4)       # (3,B,H,T,D)
    qkv = qkv.reshape(3, B * H, T, D)
    q, k, v = qkv[0], qkv[1], qkv[2]

    scale = 1.0 / math.sqrt(D)
    y = pallas_attention(q, k, v,
                         params["q_norm_w"], params["k_norm_w"],
                         params["v_norm_w"], cos, sin,
                         scale=scale)                               # (B*H,T,D) bf16

    # Merge heads back and apply the output projection.
    y = y.reshape(B, H, T, D).transpose(0, 2, 1, 3).reshape(B * T, C)
    out = pallas_matmul(y, params["w_out"], out_dtype=x.dtype)
    return out.reshape(B, T, C)


def make_rope_tables(T, D, base=10000.0):
    half = D // 2
    inv_freq = 1.0 / (base ** (jnp.arange(half, dtype=jnp.float32) * 2.0 / D))
    pos = jnp.arange(T, dtype=jnp.float32)
    ang = pos[:, None] * inv_freq[None, :]                          # (T, D/2)
    cos = jnp.concatenate([jnp.cos(ang), jnp.cos(ang)], axis=-1)    # (T, D)
    sin = jnp.concatenate([jnp.sin(ang), jnp.sin(ang)], axis=-1)
    return cos, sin


# --------------------------------------------------------------------------
# Pure-JAX f32 reference (for a loose numerical sanity check).
# --------------------------------------------------------------------------
def reference_forward(x, params, cos, sin, eps=1e-6):
    B, T, C = x.shape
    H = params["num_heads"]
    D = C // H

    qkv = (x.reshape(B * T, C) @ params["w_qkv"]).reshape(B, T, 3, H, D)
    q, k, v = qkv[:, :, 0], qkv[:, :, 1], qkv[:, :, 2]              # (B,T,H,D)

    def rms(t, w):
        var = jnp.mean(t * t, axis=-1, keepdims=True)
        return t * jax.lax.rsqrt(var + eps) * w

    def rope(t):
        half = D // 2
        t1, t2 = t[..., :half], t[..., half:]
        rot = jnp.concatenate([-t2, t1], axis=-1)
        return t * cos[None, :, None, :] + rot * sin[None, :, None, :]

    q = rope(rms(q, params["q_norm_w"]))
    k = rope(rms(k, params["k_norm_w"]))
    v = rms(v, params["v_norm_w"])

    q = q.transpose(0, 2, 1, 3)                                     # (B,H,T,D)
    k = k.transpose(0, 2, 1, 3)
    v = v.transpose(0, 2, 1, 3)
    s = jnp.einsum("bhtd,bhsd->bhts", q, k) / math.sqrt(D)
    mask = jnp.tril(jnp.ones((T, T), dtype=bool))
    s = jnp.where(mask[None, None], s, -jnp.inf)
    p = jax.nn.softmax(s, axis=-1)
    ctx = jnp.einsum("bhts,bhsd->bhtd", p, v)
    y = ctx.transpose(0, 2, 1, 3).reshape(B * T, C)
    return (y @ params["w_out"]).reshape(B, T, C)


if __name__ == "__main__":
    B, T, C, H = 2, 8, 32, 4      # dim=32, num_heads=4, head_dim=8
    D = C // H

    key = jax.random.PRNGKey(0)
    kx, kqkv, kout, kqn, kkn, kvn = jax.random.split(key, 6)

    x = jax.random.normal(kx, (B, T, C), dtype=jnp.float32)
    params = {
        "num_heads": H,
        # Linear weights stored as (in, out) so y = x @ W (== x @ W_pt.T).
        "w_qkv": jax.random.normal(kqkv, (C, 3 * C), dtype=jnp.float32) * 0.05,
        "w_out": jax.random.normal(kout, (C, C), dtype=jnp.float32) * 0.05,
        # RMSNorm weights on head_dim (query_norm / key_norm / value_norm).
        "q_norm_w": 1.0 + 0.01 * jax.random.normal(kqn, (1, D), dtype=jnp.float32),
        "k_norm_w": 1.0 + 0.01 * jax.random.normal(kkn, (1, D), dtype=jnp.float32),
        "v_norm_w": 1.0 + 0.01 * jax.random.normal(kvn, (1, D), dtype=jnp.float32),
    }
    cos, sin = make_rope_tables(T, D)

    out = causal_self_attention(x, params, cos, sin)
    out = jax.block_until_ready(out)

    assert out.shape == (B, T, C)
    assert bool(jnp.all(jnp.isfinite(out)))

    # Loose tolerance: kernel uses bf16 MXU operands + approx reciprocal.
    ref = reference_forward(x, params, cos, sin)
    max_err = float(jnp.max(jnp.abs(out - ref)))
    assert max_err < 5e-2, f"max abs error {max_err}"

    print("KERNEL_OK")
</pallas_src>

<mosaic_0001>
module attributes {stable_mosaic.version = 11 : i64} {
  func.func @_matmul_kernel(%arg0: i32, %arg1: i32, %arg2: i32, %arg3: memref<16x32xbf16, #tpu.memory_space<vmem>>, %arg4: memref<32x96xbf16, #tpu.memory_space<vmem>>, %arg5: memref<16x96xbf16, #tpu.memory_space<vmem>>, %arg6: memref<16x96xf32, #tpu.memory_space<vmem>>) attributes {dimension_semantics = [#tpu.dimension_semantics<parallel>, #tpu.dimension_semantics<parallel>, #tpu.dimension_semantics<arbitrary>], iteration_bounds = array<i64: 1, 1, 1>, scalar_prefetch = 0 : i64, scratch_operands = 1 : i64, tpu.core_type = #tpu.core_type<tc>, window_params = [{transform_indices = @transform_0, window_bounds = array<i64: 16, 32>}, {transform_indices = @transform_1, window_bounds = array<i64: 32, 96>}, {transform_indices = @transform_2, window_bounds = array<i64: 16, 96>}]} {
    %c0_i32 = arith.constant 0 : i32
    %0 = arith.cmpi eq, %arg2, %c0_i32 : i32
    %1 = arith.extui %0 : i1 to i32
    %c0_i32_0 = arith.constant 0 : i32
    %2 = arith.cmpi ne, %1, %c0_i32_0 : i32
    scf.if %2 {
      %cst_10 = arith.constant 0.000000e+00 : f32
      %12 = vector.broadcast %cst_10 : f32 to vector<16x96xf32>
      %c0_11 = arith.constant 0 : index
      %c0_12 = arith.constant 0 : index
      %13 = vector.load %arg6[%c0_11, %c0_12] : memref<16x96xf32, #tpu.memory_space<vmem>>, vector<16x96xf32>
      tpu.vector_store %arg6[%c0_11, %c0_12], %12 {strides = array<i32>} : memref<16x96xf32, #tpu.memory_space<vmem>>, vector<16x96xf32>,
    } else {
    }
    %c0 = arith.constant 0 : index
    %c0_1 = arith.constant 0 : index
    %3 = vector.load %arg6[%c0, %c0_1] : memref<16x96xf32, #tpu.memory_space<vmem>>, vector<16x96xf32>
    %c0_2 = arith.constant 0 : index
    %c0_3 = arith.constant 0 : index
    %4 = vector.load %arg3[%c0_2, %c0_3] : memref<16x32xbf16, #tpu.memory_space<vmem>>, vector<16x32xbf16>
    %c0_4 = arith.constant 0 : index
    %c0_5 = arith.constant 0 : index
    %5 = vector.load %arg4[%c0_4, %c0_5] : memref<32x96xbf16, #tpu.memory_space<vmem>>, vector<32x96xbf16>
    %cst = arith.constant dense<0.000000e+00> : vector<16x96xf32>
    %6 = tpu.matmul %4, %5, %cst {dimension_numbers = #tpu.dot_dimension_numbers<[1], [0], [0], [1], [0, 0, 1, 1], [], []>} : vector<16x32xbf16>, vector<32x96xbf16>, vector<16x96xf32> -> vector<16x96xf32>
    %7 = arith.addf %3, %6 : vector<16x96xf32>
    %c0_6 = arith.constant 0 : index
    %c0_7 = arith.constant 0 : index
    %8 = vector.load %arg6[%c0_6, %c0_7] : memref<16x96xf32, #tpu.memory_space<vmem>>, vector<16x96xf32>
    tpu.vector_store %arg6[%c0_6, %c0_7], %7 {strides = array<i32>} : memref<16x96xf32, #tpu.memory_space<vmem>>, vector<16x96xf32>,
    %c0_i32_8 = arith.constant 0 : i32
    %9 = arith.cmpi eq, %arg2, %c0_i32_8 : i32
    %10 = arith.extui %9 : i1 to i32
    %c0_i32_9 = arith.constant 0 : i32
    %11 = arith.cmpi ne, %10, %c0_i32_9 : i32
    scf.if %11 {
      %c0_10 = arith.constant 0 : index
      %c0_11 = arith.constant 0 : index
      %12 = vector.load %arg6[%c0_10, %c0_11] : memref<16x96xf32, #tpu.memory_space<vmem>>, vector<16x96xf32>
      %13 = arith.truncf %12 : vector<16x96xf32> to vector<16x96xbf16>
      %c0_12 = arith.constant 0 : index
      %c0_13 = arith.constant 0 : index
      %14 = vector.load %arg5[%c0_12, %c0_13] : memref<16x96xbf16, #tpu.memory_space<vmem>>, vector<16x96xbf16>
      tpu.vector_store %arg5[%c0_12, %c0_13], %13 {strides = array<i32>} : memref<16x96xbf16, #tpu.memory_space<vmem>>, vector<16x96xbf16>,
    } else {
    }
    return
  }
  func.func @transform_0(%arg0: i32, %arg1: i32, %arg2: i32) -> (i32, i32) {
    %c0_i32 = arith.constant 0 : i32
    return %arg0, %arg2 : i32, i32
  }
  func.func @transform_1(%arg0: i32, %arg1: i32, %arg2: i32) -> (i32, i32) {
    %c0_i32 = arith.constant 0 : i32
    return %arg2, %arg1 : i32, i32
  }
  func.func @transform_2(%arg0: i32, %arg1: i32, %arg2: i32) -> (i32, i32) {
    %c0_i32 = arith.constant 0 : i32
    return %arg0, %arg1 : i32, i32
  }
}

</mosaic_0001>

<bundles_post_ra>
// kernel: tpu_custom_call.1
= control target key start
LH: loop header
LB: loop body
LE: loop exit
PB: predicated region body
PF: predicated region fallthrough
CT: control target
= control target key end

     0   :  { %7 = vsyncpa [#allocation4], 0  ;;  %s329_s0 = inlined_call_operand.hbm [shape: bf16[16,32], index: 0, kind: input, shape index: {}]   ;;  %s330_s1 = inlined_call_operand.hbm [shape: bf16[32,96], index: 1, kind: input, shape index: {}]   ;;  %s331_s2 = inlined_call_operand.hbm [shape: bf16[16,96], index: 2, kind: output, shape index: {}]  }
   0x1   :  { %8 = vsyncpa [#allocation7], 0 }
   0x2   :  { %9 = vsyncpa [#allocation5], 0  ;;  %s258_s9 = smov [#allocation3]   ;;  %s186_s13 = scalar_lea.hbm %s329_s0, 128 }
   0x3   :  { %s15_s10 = sshll.u32 %s258_s9, 4  ;;  %p187_p0 = scmp.ne.s32.totalorder %s329_s0, %s186_s13  ;;  %s16_s10 = int_to_ptr.vmem [resolvable:$true] %s15_s10 }
   0x4   :  { %p190_p1 = scmp.lt.u32.totalorder %s186_s13, %s329_s0 }
   0x6   :  { %p192_p2 = pnand %p190_p1, %p187_p0 }
   0x8   :  { %195 = shalt.err (!%p192_p2)
}
   0x9   :  { %s196_s18 = scalar_lea.vmem %s16_s10, 128  ;;  %p201_p4 = scmp.lt.s32.totalorder %s16_s10, %s16_s10 }
   0xa   :  { %p197_p3 = scmp.ne.s32.totalorder %s16_s10, %s196_s18  ;;  %p202_p5 = scmp.lt.s32.totalorder %s196_s18, %s196_s18 }
   0xc   :  { %p203_p6 = por %p202_p5, %p201_p4 }
   0xe   :  { %p204_p7 = pnand %p203_p6, %p197_p3 }
  0x10   :  { %207 = shalt.err (!%p204_p7)
}
  0x11   :  { %s259_s19 = smov 64   ;;  %s260_s20 = smov 4  }
  0x12   :  { %21 = dma.hbm_to_vmem [thread:$0]  %s329_s0, 128, %s16_s10, [#allocation4], %s259_s19, %s259_s19, %s260_s20  }
  0x13   :  { %s261_s23 = smov [#allocation6]   ;;  %s208_s27 = scalar_lea.hbm %s330_s1, 256 }
  0x14   :  { %s27_s24 = sshll.u32 %s261_s23, 4  ;;  %p209_p8 = scmp.ne.s32.totalorder %s330_s1, %s208_s27  ;;  %s28_s24 = int_to_ptr.vmem [resolvable:$true] %s27_s24 }
  0x15   :  { %p212_p9 = scmp.lt.u32.totalorder %s208_s27, %s330_s1 }
  0x17   :  { %p214_p10 = pnand %p212_p9, %p209_p8 }
  0x19   :  { %217 = shalt.err (!%p214_p10)
}
  0x1a   :  { %s218_s4 = scalar_lea.vmem %s28_s24, 256  ;;  %p223_p12 = scmp.lt.s32.totalorder %s28_s24, %s28_s24 }
  0x1b   :  { %p219_p11 = scmp.ne.s32.totalorder %s28_s24, %s218_s4  ;;  %p224_p13 = scmp.lt.s32.totalorder %s218_s4, %s218_s4 }
  0x1d   :  { %p225_p0 = por %p224_p13, %p223_p12 }
  0x1f   :  { %p226_p1 = pnand %p225_p0, %p219_p11 }
  0x21   :  { %229 = shalt.err (!%p226_p1)
}
  0x22   :  { %33 = dma.hbm_to_vmem [thread:$0]  %s330_s1, 256, %s28_s24, [#allocation7], %s259_s19, %s259_s19, %s260_s20  }
  0x23   :  { %252 = dma.done.wait [#allocation4], 128  }
  0x24   :  { %253 = vsyncadd [#allocation4], 4294967168 }
  0x25   :  { %254 = dma.done.wait [#allocation7], 256  }
  0x26   :  { %255 = vsyncadd [#allocation7], 4294967040  ;;  %vm45_vm0 = vcmask 785408   ;;  %v262_v0 = vmov 0.0   ;;  %vm263_vm1 = vmmov 0   ;;  %v183_v1 = vld [vmem:[#allocation6] sm:$0xff]  }
  0x27   :  { %46 = vst.msk [vmem:[#allocation2] sm:$0xff] %vm45_vm0, %v262_v0  ;;  %47 = vst.msk [vmem:[#allocation2 + $0x8] sm:$0xff] %vm45_vm0, %v262_v0  ;;  %168 = vmatprep.subr.bf16.mxu0 %v262_v0  ;;  %172 = vmatprep.mubr.msk.bf16.mxu0 %vm263_vm1, %v262_v0  ;;  %v184_v2 = vld [vmem:[#allocation6 + $0x8] sm:$0xff]   ;;  %v185_v3 = vld [vmem:[#allocation3] sm:$0xff]   ;;  %vm73_vm2 = vcmask 261120   ;;  %vm136_vm3 = vcmask 781312  }
  0x28   :  { %169 = vmatpush3.bf16.msra.mxu0 %v183_v1  ;;  %s264_s1 = smov [#allocation8]  }
  0x29   :  { %170 = vmatprep.subr.bf16.mxu0 %v262_v0  ;;  %s144_s6 = sshll.u32 %s264_s1, 4  ;;  %s145_s6 = int_to_ptr.vmem [resolvable:$true] %s144_s6 }
  0x2a   :  { %s230_s7 = scalar_lea.vmem %s145_s6, 128  ;;  %p235_p3 = scmp.lt.s32.totalorder %s145_s6, %s145_s6 }
  0x2b   :  { %p231_p2 = scmp.ne.s32.totalorder %s145_s6, %s230_s7  ;;  %p236_p4 = scmp.lt.s32.totalorder %s230_s7, %s230_s7 }
  0x2c   :  { %171 = vmatpush3.bf16.msra.mxu0 %v184_v2 }
  0x2d   :  { %p237_p5 = por %p236_p4, %p235_p3 }
  0x2e   :  { %v48_v4 = vld [vmem:[#allocation2] sm:$0xff]  ;;  %v49_v6 = vld [vmem:[#allocation2 + $0x8] sm:$0xff] }
  0x2f   :  { %173 = vmatmul.mubr.msk.bf16.vlgmr.msra.gmra.mrb[0].mxu0 %vm73_vm2, %v185_v3  ;;  %p238_p6 = pnand %p237_p5, %p231_p2 }
 0x102   :  { %v111_v5 = vpop.f32.mrb[0].mxu0 }
 0x103   :  { %v118_v7 = vadd.f32 %v111_v5, %v48_v4  ;;  %v174_v8 = vpop.f32.mrb[1].mxu0 }
 0x104   :  { %v114_v9 = vpop.f32.mrb[2].mxu0 }
 0x105   :  { %121 = vst.msk [vmem:[#allocation2] sm:$0xff] %vm45_vm0, %v118_v7  ;;  %v119_v10 = vadd.f32 %v114_v9, %v49_v6  ;;  %v175_v11 = vpop.f32.mrb[3].mxu0 }
 0x107   :  { %122 = vst.msk [vmem:[#allocation2 + $0x8] sm:$0xff] %vm45_vm0, %v119_v10 }
 0x10c   :  { %v126_v12 = vld [vmem:[#allocation2] sm:$0xff] }
 0x10d   :  { %v163_v13 = vpack.c.bf16 %v126_v12, %v126_v12 }
 0x10e   :  { %v127_v14 = vld [vmem:[#allocation2 + $0x8] sm:$0xff] }
 0x10f   :  { %v164_v15 = vpack.c.bf16 %v127_v14, %v127_v14  ;;  %137 = vst.msk [vmem:[#allocation8] sm:$0xf] %vm136_vm3, %v163_v13 }
 0x111   :  { %138 = vst.msk [vmem:[#allocation8 + $0x4] sm:$0xf] %vm136_vm3, %v164_v15 }
 0x112   :  { %241 = shalt.err (!%p238_p6)
}
 0x113   :  { %s242_s10 = scalar_lea.hbm %s331_s2, 128 }
 0x114   :  { %p243_p7 = scmp.ne.s32.totalorder %s331_s2, %s242_s10  ;;  %p246_p8 = scmp.lt.u32.totalorder %s242_s10, %s331_s2 }
 0x116   :  { %p248_p9 = pnand %p246_p8, %p243_p7 }
 0x118   :  { %251 = shalt.err (!%p248_p9)
}
 0x119   :  { %150 = dma.vmem_to_hbm [thread:$0]  %s145_s6, 128, %s331_s2, [#allocation5], %s259_s19, %s259_s19, %s260_s20  }
 0x11a   :  { %256 = dma.done.wait [#allocation5], 128  }
 0x11b   :  { %257 = vsyncadd [#allocation5], 4294967168 }
 0x11c   :  { %154 = vsyncpa [#allocation4], 1 }
 0x11d   :  { %155 = vsyncpa [#allocation7], 1 }
 0x11e   :  { %156 = vsyncpa [#allocation5], 1 }

</bundles_post_ra>
